<compile_context>
chip_gen: v5e
topology: v5e:2x2
jax: 0.10.0
libtpu: 0.0.40
codegen_flags: <defaults>
</compile_context>

<pallas_src>
import jax
import jax.numpy as jnp
from jax.experimental import pallas as pl
from jax.experimental.pallas import tpu as pltpu

IN_DIM = 3
HID = 64
OUT_DIM = 1
N_HIDDEN_LAYERS = 7  # layer2_1, 2_3, 2_4, 2_5, 2_6, 2_7, 2_8 (2_2 unused in forward)


def _round_up(n, m):
    return ((n + m - 1) // m) * m


def mlp_kernel(x_ref, w1_ref, b1_ref, w2_ref, b2_ref, w3_ref, b3_ref, o_ref):
    # ----- layer1 (3 -> 64): K=3 "matmul" as 3 VPU broadcast-FMAs (no MXU) -----
    # x_ref: (IN_DIM, TB, 1), w1_ref: (IN_DIM, 1, HID)  ->  (TB,1)*(1,HID) broadcasts.
    h = x_ref[0] * w1_ref[0]
    for k in range(1, IN_DIM):
        h = h + x_ref[k] * w1_ref[k]
    h = jnp.maximum(h + b1_ref[...], 0.0)  # exact f32 epilogue

    # ----- 7 hidden layers (64 -> 64): MXU, bf16 inputs / f32 accumulate -----
    for i in range(N_HIDDEN_LAYERS):
        h = jnp.dot(h.astype(jnp.bfloat16), w2_ref[i],
                    preferred_element_type=jnp.float32)
        h = jnp.maximum(h + b2_ref[i], 0.0)  # bias + ReLU stay in f32

    # ----- layer3 (64 -> 1): elementwise mul + lane reduction (XLU), no N=1 matmul -----
    o = jnp.sum(h * w3_ref[...], axis=-1, keepdims=True) + b3_ref[...]
    o_ref[...] = o.astype(o_ref.dtype)


def mlp_forward(x, params, *, block_batch=512):
    """x: (batch, 3) f32. params in natural [in, out] layout (see init_params)."""
    w1, b1, w2, b2, w3, b3 = params
    batch = x.shape[0]

    # Batch tile: <= block_batch rows, always a multiple of 8 (sublanes); small
    # batches collapse to a single grid step.
    tb = min(block_batch, _round_up(batch, 8))
    batch_p = _round_up(batch, tb)
    if batch_p != batch:
        x = jnp.pad(x, ((0, batch_p - batch), (0, 0)))
    num_blocks = batch_p // tb

    # Layouts handed to the kernel:
    #   x   -> (IN_DIM, batch_p, 1)  per-feature columns, broadcast source at lane 0
    #   w1  -> (IN_DIM, 1, HID)
    #   w2  -> (7, HID, HID) in bf16 (MXU-native, half the VMEM)
    #   w3  -> (1, HID)              final layer becomes mul + lane reduce
    xk = jnp.transpose(x, (1, 0))[:, :, None].astype(jnp.float32)
    w1k = w1[:, None, :].astype(jnp.float32)
    w2k = w2.astype(jnp.bfloat16)
    w3k = jnp.transpose(w3, (1, 0)).astype(jnp.float32)

    def const_spec(shape):
        # Block index never changes across the grid -> weights stay VMEM-resident.
        return pl.BlockSpec(shape, lambda i, _s=shape: (0,) * len(_s))

    out = pl.pallas_call(
        mlp_kernel,
        out_shape=jax.ShapeDtypeStruct((batch_p, OUT_DIM), jnp.float32),
        grid=(num_blocks,),
        in_specs=[
            pl.BlockSpec((IN_DIM, tb, 1), lambda i: (0, i, 0)),  # x columns
            const_spec((IN_DIM, 1, HID)),                        # w1
            const_spec((1, HID)),                                # b1
            const_spec((N_HIDDEN_LAYERS, HID, HID)),             # w2 (bf16)
            const_spec((N_HIDDEN_LAYERS, 1, HID)),               # b2
            const_spec((1, HID)),                                # w3 (row)
            const_spec((1, OUT_DIM)),                            # b3
        ],
        out_specs=pl.BlockSpec((tb, OUT_DIM), lambda i: (i, 0)),
        compiler_params=pltpu.CompilerParams(
            dimension_semantics=("parallel",)),
    )(xk, w1k, b1, w2k, b2, w3k, b3)
    return out[:batch]


def init_params(key):
    """Deterministic init mimicking torch.nn.Linear default U(-1/sqrt(fan_in), +)."""
    keys = jax.random.split(key, 6)

    def uni(k, shape, fan_in):
        bound = 1.0 / jnp.sqrt(jnp.float32(fan_in))
        return jax.random.uniform(k, shape, jnp.float32, -bound, bound)

    w1 = uni(keys[0], (IN_DIM, HID), IN_DIM)                 # [in, out]
    b1 = uni(keys[1], (1, HID), IN_DIM)
    w2 = uni(keys[2], (N_HIDDEN_LAYERS, HID, HID), HID)
    b2 = uni(keys[3], (N_HIDDEN_LAYERS, 1, HID), HID)
    w3 = uni(keys[4], (HID, OUT_DIM), HID)
    b3 = uni(keys[5], (1, OUT_DIM), HID)
    return (w1, b1, w2, b2, w3, b3)


def mlp_reference_f32(x, params):
    """Pure-JAX f32 reference of the same forward pass."""
    w1, b1, w2, b2, w3, b3 = params
    h = jnp.maximum(x @ w1 + b1, 0.0)
    for i in range(N_HIDDEN_LAYERS):
        h = jnp.maximum(h @ w2[i] + b2[i], 0.0)
    return h @ w3 + b3


def mlp_reference_bf16(x, params):
    """Reference mirroring the kernel's numerics (bf16 matmul inputs, f32 acc)."""
    w1, b1, w2, b2, w3, b3 = params
    h = jnp.maximum(x @ w1 + b1, 0.0)
    w2b = w2.astype(jnp.bfloat16)
    for i in range(N_HIDDEN_LAYERS):
        h = jnp.dot(h.astype(jnp.bfloat16), w2b[i],
                    preferred_element_type=jnp.float32)
        h = jnp.maximum(h + b2[i], 0.0)
    return h @ w3 + b3


if __name__ == "__main__":
    key = jax.random.PRNGKey(0)
    pkey, xkey1, xkey2, xkey3 = jax.random.split(key, 4)
    params = init_params(pkey)

    # batch=8: single grid step; batch=300: single padded step;
    # batch=700: multi-step grid (tb=512) + remainder padding.
    for batch, xkey in ((8, xkey1), (300, xkey2), (700, xkey3)):
        x = jax.random.normal(xkey, (batch, IN_DIM), jnp.float32)
        out = jax.block_until_ready(mlp_forward(x, params))
        assert out.shape == (batch, OUT_DIM), out.shape

        ref_bf16 = mlp_reference_bf16(x, params)   # same numerics as the kernel
        ref_f32 = mlp_reference_f32(x, params)     # full-precision sanity check
        assert jnp.allclose(out, ref_bf16, atol=5e-3, rtol=5e-3), (
            f"batch={batch}: max abs err vs bf16 ref "
            f"{jnp.max(jnp.abs(out - ref_bf16))}")
        assert jnp.allclose(out, ref_f32, atol=1e-1, rtol=1e-1), (
            f"batch={batch}: max abs err vs f32 ref "
            f"{jnp.max(jnp.abs(out - ref_f32))}")

    print("KERNEL_OK")
</pallas_src>

<mosaic_0001>
module attributes {stable_mosaic.version = 11 : i64} {
  func.func @mlp_kernel(%arg0: i32, %arg1: memref<3x8x1xf32, #tpu.memory_space<vmem>>, %arg2: memref<3x1x64xf32, #tpu.memory_space<vmem>>, %arg3: memref<1x64xf32, #tpu.memory_space<vmem>>, %arg4: memref<7x64x64xbf16, #tpu.memory_space<vmem>>, %arg5: memref<7x1x64xf32, #tpu.memory_space<vmem>>, %arg6: memref<1x64xf32, #tpu.memory_space<vmem>>, %arg7: memref<1x1xf32, #tpu.memory_space<vmem>>, %arg8: memref<8x1xf32, #tpu.memory_space<vmem>>) attributes {dimension_semantics = [#tpu.dimension_semantics<parallel>], iteration_bounds = array<i64: 1>, scalar_prefetch = 0 : i64, scratch_operands = 0 : i64, tpu.core_type = #tpu.core_type<tc>, window_params = [{transform_indices = @transform_0, window_bounds = array<i64: 3, 8, 1>}, {pipeline_mode = #tpu.pipeline_mode<synchronous>, transform_indices = @transform_1, window_bounds = array<i64: 3, 1, 64>}, {pipeline_mode = #tpu.pipeline_mode<synchronous>, transform_indices = @transform_2, window_bounds = array<i64: 1, 64>}, {pipeline_mode = #tpu.pipeline_mode<synchronous>, transform_indices = @transform_3, window_bounds = array<i64: 7, 64, 64>}, {pipeline_mode = #tpu.pipeline_mode<synchronous>, transform_indices = @transform_4, window_bounds = array<i64: 7, 1, 64>}, {pipeline_mode = #tpu.pipeline_mode<synchronous>, transform_indices = @transform_5, window_bounds = array<i64: 1, 64>}, {pipeline_mode = #tpu.pipeline_mode<synchronous>, transform_indices = @transform_6, window_bounds = array<i64: 1, 1>}, {transform_indices = @transform_7, window_bounds = array<i64: 8, 1>}]} {
    %c0 = arith.constant 0 : index
    %c0_0 = arith.constant 0 : index
    %c0_1 = arith.constant 0 : index
    %0 = vector.load %arg1[%c0, %c0_0, %c0_1] : memref<3x8x1xf32, #tpu.memory_space<vmem>>, vector<1x8x1xf32>
    %1 = vector.shape_cast %0 : vector<1x8x1xf32> to vector<8x1xf32>
    %c0_2 = arith.constant 0 : index
    %c0_3 = arith.constant 0 : index
    %c0_4 = arith.constant 0 : index
    %2 = vector.load %arg2[%c0_2, %c0_3, %c0_4] : memref<3x1x64xf32, #tpu.memory_space<vmem>>, vector<1x1x64xf32>
    %3 = vector.shape_cast %2 : vector<1x1x64xf32> to vector<1x64xf32>
    %4 = vector.broadcast %1 : vector<8x1xf32> to vector<8x64xf32>
    %5 = vector.broadcast %3 : vector<1x64xf32> to vector<8x64xf32>
    %6 = arith.mulf %4, %5 : vector<8x64xf32>
    %c1 = arith.constant 1 : index
    %c0_5 = arith.constant 0 : index
    %c0_6 = arith.constant 0 : index
    %7 = vector.load %arg1[%c1, %c0_5, %c0_6] : memref<3x8x1xf32, #tpu.memory_space<vmem>>, vector<1x8x1xf32>
    %8 = vector.shape_cast %7 : vector<1x8x1xf32> to vector<8x1xf32>
    %c1_7 = arith.constant 1 : index
    %c0_8 = arith.constant 0 : index
    %c0_9 = arith.constant 0 : index
    %9 = vector.load %arg2[%c1_7, %c0_8, %c0_9] : memref<3x1x64xf32, #tpu.memory_space<vmem>>, vector<1x1x64xf32>
    %10 = vector.shape_cast %9 : vector<1x1x64xf32> to vector<1x64xf32>
    %11 = vector.broadcast %8 : vector<8x1xf32> to vector<8x64xf32>
    %12 = vector.broadcast %10 : vector<1x64xf32> to vector<8x64xf32>
    %13 = arith.mulf %11, %12 : vector<8x64xf32>
    %14 = arith.addf %6, %13 : vector<8x64xf32>
    %c2 = arith.constant 2 : index
    %c0_10 = arith.constant 0 : index
    %c0_11 = arith.constant 0 : index
    %15 = vector.load %arg1[%c2, %c0_10, %c0_11] : memref<3x8x1xf32, #tpu.memory_space<vmem>>, vector<1x8x1xf32>
    %16 = vector.shape_cast %15 : vector<1x8x1xf32> to vector<8x1xf32>
    %c2_12 = arith.constant 2 : index
    %c0_13 = arith.constant 0 : index
    %c0_14 = arith.constant 0 : index
    %17 = vector.load %arg2[%c2_12, %c0_13, %c0_14] : memref<3x1x64xf32, #tpu.memory_space<vmem>>, vector<1x1x64xf32>
    %18 = vector.shape_cast %17 : vector<1x1x64xf32> to vector<1x64xf32>
    %19 = vector.broadcast %16 : vector<8x1xf32> to vector<8x64xf32>
    %20 = vector.broadcast %18 : vector<1x64xf32> to vector<8x64xf32>
    %21 = arith.mulf %19, %20 : vector<8x64xf32>
    %22 = arith.addf %14, %21 : vector<8x64xf32>
    %c0_15 = arith.constant 0 : index
    %c0_16 = arith.constant 0 : index
    %23 = vector.load %arg3[%c0_15, %c0_16] : memref<1x64xf32, #tpu.memory_space<vmem>>, vector<1x64xf32>
    %24 = vector.broadcast %23 : vector<1x64xf32> to vector<8x64xf32>
    %25 = arith.addf %22, %24 : vector<8x64xf32>
    %cst = arith.constant 0.000000e+00 : f32
    %26 = vector.broadcast %cst : f32 to vector<8x64xf32>
    %27 = arith.maximumf %25, %26 : vector<8x64xf32>
    %28 = arith.truncf %27 : vector<8x64xf32> to vector<8x64xbf16>
    %c0_17 = arith.constant 0 : index
    %c0_18 = arith.constant 0 : index
    %c0_19 = arith.constant 0 : index
    %29 = vector.load %arg4[%c0_17, %c0_18, %c0_19] : memref<7x64x64xbf16, #tpu.memory_space<vmem>>, vector<1x64x64xbf16>
    %30 = vector.shape_cast %29 : vector<1x64x64xbf16> to vector<64x64xbf16>
    %cst_20 = arith.constant dense<0.000000e+00> : vector<8x64xf32>
    %31 = tpu.matmul %28, %30, %cst_20 {dimension_numbers = #tpu.dot_dimension_numbers<[1], [0], [0], [1], [0, 0, 1, 1], [], []>} : vector<8x64xbf16>, vector<64x64xbf16>, vector<8x64xf32> -> vector<8x64xf32>
    %c0_21 = arith.constant 0 : index
    %c0_22 = arith.constant 0 : index
    %c0_23 = arith.constant 0 : index
    %32 = vector.load %arg5[%c0_21, %c0_22, %c0_23] : memref<7x1x64xf32, #tpu.memory_space<vmem>>, vector<1x1x64xf32>
    %33 = vector.shape_cast %32 : vector<1x1x64xf32> to vector<1x64xf32>
    %34 = vector.broadcast %33 : vector<1x64xf32> to vector<8x64xf32>
    %35 = arith.addf %31, %34 : vector<8x64xf32>
    %cst_24 = arith.constant 0.000000e+00 : f32
    %36 = vector.broadcast %cst_24 : f32 to vector<8x64xf32>
    %37 = arith.maximumf %35, %36 : vector<8x64xf32>
    %38 = arith.truncf %37 : vector<8x64xf32> to vector<8x64xbf16>
    %c1_25 = arith.constant 1 : index
    %c0_26 = arith.constant 0 : index
    %c0_27 = arith.constant 0 : index
    %39 = vector.load %arg4[%c1_25, %c0_26, %c0_27] : memref<7x64x64xbf16, #tpu.memory_space<vmem>>, vector<1x64x64xbf16>
    %40 = vector.shape_cast %39 : vector<1x64x64xbf16> to vector<64x64xbf16>
    %cst_28 = arith.constant dense<0.000000e+00> : vector<8x64xf32>
    %41 = tpu.matmul %38, %40, %cst_28 {dimension_numbers = #tpu.dot_dimension_numbers<[1], [0], [0], [1], [0, 0, 1, 1], [], []>} : vector<8x64xbf16>, vector<64x64xbf16>, vector<8x64xf32> -> vector<8x64xf32>
    %c1_29 = arith.constant 1 : index
    %c0_30 = arith.constant 0 : index
    %c0_31 = arith.constant 0 : index
    %42 = vector.load %arg5[%c1_29, %c0_30, %c0_31] : memref<7x1x64xf32, #tpu.memory_space<vmem>>, vector<1x1x64xf32>
    %43 = vector.shape_cast %42 : vector<1x1x64xf32> to vector<1x64xf32>
    %44 = vector.broadcast %43 : vector<1x64xf32> to vector<8x64xf32>
    %45 = arith.addf %41, %44 : vector<8x64xf32>
    %cst_32 = arith.constant 0.000000e+00 : f32
    %46 = vector.broadcast %cst_32 : f32 to vector<8x64xf32>
    %47 = arith.maximumf %45, %46 : vector<8x64xf32>
    %48 = arith.truncf %47 : vector<8x64xf32> to vector<8x64xbf16>
    %c2_33 = arith.constant 2 : index
    %c0_34 = arith.constant 0 : index
    %c0_35 = arith.constant 0 : index
    %49 = vector.load %arg4[%c2_33, %c0_34, %c0_35] : memref<7x64x64xbf16, #tpu.memory_space<vmem>>, vector<1x64x64xbf16>
    %50 = vector.shape_cast %49 : vector<1x64x64xbf16> to vector<64x64xbf16>
    %cst_36 = arith.constant dense<0.000000e+00> : vector<8x64xf32>
    %51 = tpu.matmul %48, %50, %cst_36 {dimension_numbers = #tpu.dot_dimension_numbers<[1], [0], [0], [1], [0, 0, 1, 1], [], []>} : vector<8x64xbf16>, vector<64x64xbf16>, vector<8x64xf32> -> vector<8x64xf32>
    %c2_37 = arith.constant 2 : index
    %c0_38 = arith.constant 0 : index
    %c0_39 = arith.constant 0 : index
    %52 = vector.load %arg5[%c2_37, %c0_38, %c0_39] : memref<7x1x64xf32, #tpu.memory_space<vmem>>, vector<1x1x64xf32>
    %53 = vector.shape_cast %52 : vector<1x1x64xf32> to vector<1x64xf32>
    %54 = vector.broadcast %53 : vector<1x64xf32> to vector<8x64xf32>
    %55 = arith.addf %51, %54 : vector<8x64xf32>
    %cst_40 = arith.constant 0.000000e+00 : f32
    %56 = vector.broadcast %cst_40 : f32 to vector<8x64xf32>
    %57 = arith.maximumf %55, %56 : vector<8x64xf32>
    %58 = arith.truncf %57 : vector<8x64xf32> to vector<8x64xbf16>
    %c3 = arith.constant 3 : index
    %c0_41 = arith.constant 0 : index
    %c0_42 = arith.constant 0 : index
    %59 = vector.load %arg4[%c3, %c0_41, %c0_42] : memref<7x64x64xbf16, #tpu.memory_space<vmem>>, vector<1x64x64xbf16>
    %60 = vector.shape_cast %59 : vector<1x64x64xbf16> to vector<64x64xbf16>
    %cst_43 = arith.constant dense<0.000000e+00> : vector<8x64xf32>
    %61 = tpu.matmul %58, %60, %cst_43 {dimension_numbers = #tpu.dot_dimension_numbers<[1], [0], [0], [1], [0, 0, 1, 1], [], []>} : vector<8x64xbf16>, vector<64x64xbf16>, vector<8x64xf32> -> vector<8x64xf32>
    %c3_44 = arith.constant 3 : index
    %c0_45 = arith.constant 0 : index
    %c0_46 = arith.constant 0 : index
    %62 = vector.load %arg5[%c3_44, %c0_45, %c0_46] : memref<7x1x64xf32, #tpu.memory_space<vmem>>, vector<1x1x64xf32>
    %63 = vector.shape_cast %62 : vector<1x1x64xf32> to vector<1x64xf32>
    %64 = vector.broadcast %63 : vector<1x64xf32> to vector<8x64xf32>
    %65 = arith.addf %61, %64 : vector<8x64xf32>
    %cst_47 = arith.constant 0.000000e+00 : f32
    %66 = vector.broadcast %cst_47 : f32 to vector<8x64xf32>
    %67 = arith.maximumf %65, %66 : vector<8x64xf32>
    %68 = arith.truncf %67 : vector<8x64xf32> to vector<8x64xbf16>
    %c4 = arith.constant 4 : index
    %c0_48 = arith.constant 0 : index
    %c0_49 = arith.constant 0 : index
    %69 = vector.load %arg4[%c4, %c0_48, %c0_49] : memref<7x64x64xbf16, #tpu.memory_space<vmem>>, vector<1x64x64xbf16>
    %70 = vector.shape_cast %69 : vector<1x64x64xbf16> to vector<64x64xbf16>
    %cst_50 = arith.constant dense<0.000000e+00> : vector<8x64xf32>
    %71 = tpu.matmul %68, %70, %cst_50 {dimension_numbers = #tpu.dot_dimension_numbers<[1], [0], [0], [1], [0, 0, 1, 1], [], []>} : vector<8x64xbf16>, vector<64x64xbf16>, vector<8x64xf32> -> vector<8x64xf32>
    %c4_51 = arith.constant 4 : index
    %c0_52 = arith.constant 0 : index
    %c0_53 = arith.constant 0 : index
    %72 = vector.load %arg5[%c4_51, %c0_52, %c0_53] : memref<7x1x64xf32, #tpu.memory_space<vmem>>, vector<1x1x64xf32>
    %73 = vector.shape_cast %72 : vector<1x1x64xf32> to vector<1x64xf32>
    %74 = vector.broadcast %73 : vector<1x64xf32> to vector<8x64xf32>
    %75 = arith.addf %71, %74 : vector<8x64xf32>
    %cst_54 = arith.constant 0.000000e+00 : f32
    %76 = vector.broadcast %cst_54 : f32 to vector<8x64xf32>
    %77 = arith.maximumf %75, %76 : vector<8x64xf32>
    %78 = arith.truncf %77 : vector<8x64xf32> to vector<8x64xbf16>
    %c5 = arith.constant 5 : index
    %c0_55 = arith.constant 0 : index
    %c0_56 = arith.constant 0 : index
    %79 = vector.load %arg4[%c5, %c0_55, %c0_56] : memref<7x64x64xbf16, #tpu.memory_space<vmem>>, vector<1x64x64xbf16>
    %80 = vector.shape_cast %79 : vector<1x64x64xbf16> to vector<64x64xbf16>
    %cst_57 = arith.constant dense<0.000000e+00> : vector<8x64xf32>
    %81 = tpu.matmul %78, %80, %cst_57 {dimension_numbers = #tpu.dot_dimension_numbers<[1], [0], [0], [1], [0, 0, 1, 1], [], []>} : vector<8x64xbf16>, vector<64x64xbf16>, vector<8x64xf32> -> vector<8x64xf32>
    %c5_58 = arith.constant 5 : index
    %c0_59 = arith.constant 0 : index
    %c0_60 = arith.constant 0 : index
    %82 = vector.load %arg5[%c5_58, %c0_59, %c0_60] : memref<7x1x64xf32, #tpu.memory_space<vmem>>, vector<1x1x64xf32>
    %83 = vector.shape_cast %82 : vector<1x1x64xf32> to vector<1x64xf32>
    %84 = vector.broadcast %83 : vector<1x64xf32> to vector<8x64xf32>
    %85 = arith.addf %81, %84 : vector<8x64xf32>
    %cst_61 = arith.constant 0.000000e+00 : f32
    %86 = vector.broadcast %cst_61 : f32 to vector<8x64xf32>
    %87 = arith.maximumf %85, %86 : vector<8x64xf32>
    %88 = arith.truncf %87 : vector<8x64xf32> to vector<8x64xbf16>
    %c6 = arith.constant 6 : index
    %c0_62 = arith.constant 0 : index
    %c0_63 = arith.constant 0 : index
    %89 = vector.load %arg4[%c6, %c0_62, %c0_63] : memref<7x64x64xbf16, #tpu.memory_space<vmem>>, vector<1x64x64xbf16>
    %90 = vector.shape_cast %89 : vector<1x64x64xbf16> to vector<64x64xbf16>
    %cst_64 = arith.constant dense<0.000000e+00> : vector<8x64xf32>
    %91 = tpu.matmul %88, %90, %cst_64 {dimension_numbers = #tpu.dot_dimension_numbers<[1], [0], [0], [1], [0, 0, 1, 1], [], []>} : vector<8x64xbf16>, vector<64x64xbf16>, vector<8x64xf32> -> vector<8x64xf32>
    %c6_65 = arith.constant 6 : index
    %c0_66 = arith.constant 0 : index
    %c0_67 = arith.constant 0 : index
    %92 = vector.load %arg5[%c6_65, %c0_66, %c0_67] : memref<7x1x64xf32, #tpu.memory_space<vmem>>, vector<1x1x64xf32>
    %93 = vector.shape_cast %92 : vector<1x1x64xf32> to vector<1x64xf32>
    %94 = vector.broadcast %93 : vector<1x64xf32> to vector<8x64xf32>
    %95 = arith.addf %91, %94 : vector<8x64xf32>
    %cst_68 = arith.constant 0.000000e+00 : f32
    %96 = vector.broadcast %cst_68 : f32 to vector<8x64xf32>
    %97 = arith.maximumf %95, %96 : vector<8x64xf32>
    %c0_69 = arith.constant 0 : index
    %c0_70 = arith.constant 0 : index
    %98 = vector.load %arg6[%c0_69, %c0_70] : memref<1x64xf32, #tpu.memory_space<vmem>>, vector<1x64xf32>
    %99 = vector.broadcast %98 : vector<1x64xf32> to vector<8x64xf32>
    %100 = arith.mulf %97, %99 : vector<8x64xf32>
    %cst_71 = arith.constant dense<0.000000e+00> : vector<8xf32>
    %101 = vector.multi_reduction <add>, %100, %cst_71 [1] : vector<8x64xf32> to vector<8xf32>
    %102 = vector.shape_cast %101 : vector<8xf32> to vector<8x1xf32>
    %c0_72 = arith.constant 0 : index
    %c0_73 = arith.constant 0 : index
    %103 = vector.load %arg7[%c0_72, %c0_73] : memref<1x1xf32, #tpu.memory_space<vmem>>, vector<1x1xf32>
    %104 = vector.broadcast %103 : vector<1x1xf32> to vector<8x1xf32>
    %105 = arith.addf %102, %104 : vector<8x1xf32>
    %c0_74 = arith.constant 0 : index
    %c0_75 = arith.constant 0 : index
    %106 = vector.load %arg8[%c0_74, %c0_75] : memref<8x1xf32, #tpu.memory_space<vmem>>, vector<8x1xf32>
    tpu.vector_store %arg8[%c0_74, %c0_75], %105 {strides = array<i32>} : memref<8x1xf32, #tpu.memory_space<vmem>>, vector<8x1xf32>,
    return
  }
  func.func @transform_0(%arg0: i32) -> (i32, i32, i32) {
    %c0_i32 = arith.constant 0 : i32
    %c0_i32_0 = arith.constant 0 : i32
    %c0_i32_1 = arith.constant 0 : i32
    return %c0_i32, %arg0, %c0_i32_0 : i32, i32, i32
  }
  func.func @transform_1(%arg0: i32) -> (i32, i32, i32) {
    %c0_i32 = arith.constant 0 : i32
    %c0_i32_0 = arith.constant 0 : i32
    %c0_i32_1 = arith.constant 0 : i32
    %c0_i32_2 = arith.constant 0 : i32
    return %c0_i32, %c0_i32_0, %c0_i32_1 : i32, i32, i32
  }
  func.func @transform_2(%arg0: i32) -> (i32, i32) {
    %c0_i32 = arith.constant 0 : i32
    %c0_i32_0 = arith.constant 0 : i32
    %c0_i32_1 = arith.constant 0 : i32
    return %c0_i32, %c0_i32_0 : i32, i32
  }
  func.func @transform_3(%arg0: i32) -> (i32, i32, i32) {
    %c0_i32 = arith.constant 0 : i32
    %c0_i32_0 = arith.constant 0 : i32
    %c0_i32_1 = arith.constant 0 : i32
    %c0_i32_2 = arith.constant 0 : i32
    return %c0_i32, %c0_i32_0, %c0_i32_1 : i32, i32, i32
  }
  func.func @transform_4(%arg0: i32) -> (i32, i32, i32) {
    %c0_i32 = arith.constant 0 : i32
    %c0_i32_0 = arith.constant 0 : i32
    %c0_i32_1 = arith.constant 0 : i32
    %c0_i32_2 = arith.constant 0 : i32
    return %c0_i32, %c0_i32_0, %c0_i32_1 : i32, i32, i32
  }
  func.func @transform_5(%arg0: i32) -> (i32, i32) {
    %c0_i32 = arith.constant 0 : i32
    %c0_i32_0 = arith.constant 0 : i32
    %c0_i32_1 = arith.constant 0 : i32
    return %c0_i32, %c0_i32_0 : i32, i32
  }
  func.func @transform_6(%arg0: i32) -> (i32, i32) {
    %c0_i32 = arith.constant 0 : i32
    %c0_i32_0 = arith.constant 0 : i32
    %c0_i32_1 = arith.constant 0 : i32
    return %c0_i32, %c0_i32_0 : i32, i32
  }
  func.func @transform_7(%arg0: i32) -> (i32, i32) {
    %c0_i32 = arith.constant 0 : i32
    %c0_i32_0 = arith.constant 0 : i32
    return %arg0, %c0_i32 : i32, i32
  }
}

</mosaic_0001>

<bundles_post_ra>
// kernel: tpu_custom_call.1
= control target key start
LH: loop header
LB: loop body
LE: loop exit
PB: predicated region body
PF: predicated region fallthrough
CT: control target
= control target key end

     0   :  { %s809_s0 = inlined_call_operand.vmem [shape: f32[3,8,1], index: 0, kind: input, shape index: {}]   ;;  %s810_s1 = inlined_call_operand.vmem [shape: f32[3,1,64], index: 1, kind: input, shape index: {}]   ;;  %s811_s2 = inlined_call_operand.vmem [shape: f32[1,64], index: 2, kind: input, shape index: {}]   ;;  %s812_s3 = inlined_call_operand.hbm [shape: bf16[7,64,64], index: 3, kind: input, shape index: {}]   ;;  %s813_s4 = inlined_call_operand.vmem [shape: f32[7,1,64], index: 4, kind: input, shape index: {}]   ;;  %s814_s5 = inlined_call_operand.vmem [shape: f32[1,64], index: 5, kind: input, shape index: {}]   ;;  %s815_s6 = inlined_call_operand.<no memory space> [shape: f32[1,1], index: 6, kind: input, shape index: {}]   ;;  %s816_s7 = inlined_call_operand.vmem [shape: f32[8,1], index: 7, kind: output, shape index: {}]  }
   0x1   :  { %v12_v0 = vstv %s815_s6 }
   0x2   :  { %13 = vst [vmem:[#allocation2] sm:$0x1] %v12_v0 }
   0x3   :  { %14 = vsyncpa [#allocation4], 0  ;;  %s25_s28 = sshll.u32 %s812_s3, 4  ;;  %s703_s29 = smov [#allocation3]   ;;  %s26_s28 = int_to_ptr.hbm [resolvable:$true] %s25_s28 }
   0x4   :  { %s27_s30 = sshll.u32 %s703_s29, 4  ;;  %s704_s8 = smov 64   ;;  %s28_s30 = int_to_ptr.vmem [resolvable:$true] %s27_s30 }
   0x5   :  { %s705_s9 = smov 4  }
   0x6   :  { %33 = dma.hbm_to_vmem [thread:$0]  %s26_s28, 3584, %s28_s30, [#allocation4], %s704_s8, %s704_s8, %s705_s9  }
   0x7   :  { %701 = dma.done.wait [#allocation4], 3584  }
   0x8   :  { %702 = vsyncadd [#allocation4], 4294963712  ;;  %v706_v1 = vmov 0   ;;  %v45_v2 = vld [vmem:[%s809_s0] sm:$0xff]  ;;  %v503_v3 = vld [vmem:[%s809_s0 + $0x10] sm:$0xff]  ;;  %vm127_vm0 = vcmask 523264  }
   0x9   :  { %662 = vset.pattern.permute.xlu0 %v706_v1  ;;  %663 = vset.pattern.permute.xlu1 %v706_v1  ;;  %v501_v4 = vld [vmem:[%s809_s0 + $0x8] sm:$0xff]  ;;  %v633_v5 = vld [vmem:[#allocation3 + $0x18] sm:$0xff]  ;;  %v632_v6 = vld [vmem:[#allocation3 + $0x10] sm:$0xff]  ;;  %vm494_vm1 = vcmask 7168  }
   0xa   :  { %49 = vperm.xlu0 %662, %v45_v2   ;;  %76 = vperm.xlu1 %663, %v503_v3   ;;  %v631_v7 = vld [vmem:[#allocation3 + $0x8] sm:$0xff]  ;;  %v630_v8 = vld [vmem:[#allocation3] sm:$0xff]  ;;  %v637_v9 = vld [vmem:[#allocation3 + $0x38] sm:$0xff] }
   0xb   :  { %135 = vmatpush.bf16.msra.mxu0 %v633_v5  ;;  %191 = vmatpush.bf16.msra.mxu1 %v637_v9  ;;  %v636_v10 = vld [vmem:[#allocation3 + $0x30] sm:$0xff]  ;;  %v664_v12 = vld [vmem:[%s810_s1] ss:$0 sm:$0xff]  ;;  %v665_v13 = vld [vmem:[%s810_s1 + $0x1] ss:$0 sm:$0xff] }
   0xc   :  { %v666_v14 = vld [vmem:[%s810_s1 + $0x2] ss:$0 sm:$0xff]  ;;  %v667_v21 = vld [vmem:[%s811_s2] ss:$0 sm:$0xff]  ;;  %v635_v26 = vld [vmem:[#allocation3 + $0x28] sm:$0xff] }
   0xd   :  { %v634_v27 = vld [vmem:[#allocation3 + $0x20] sm:$0xff]  ;;  %v641_v28 = vld [vmem:[#allocation3 + $0x58] sm:$0xff]  ;;  %v640_v29 = vld [vmem:[#allocation3 + $0x50] sm:$0xff] }
   0xe   :  { %247 = vmatpush.bf16.msra.mxu2 %v641_v28  ;;  %v668_v30 = vld [vmem:[%s813_s4] ss:$0 sm:$0xff]  ;;  %v639_v36 = vld [vmem:[#allocation3 + $0x48] sm:$0xff]  ;;  %v638_v37 = vld [vmem:[#allocation3 + $0x40] sm:$0xff] }
   0xf   :  { %136 = vmatpush.bf16.msra.mxu0 %v632_v6  ;;  %192 = vmatpush.bf16.msra.mxu1 %v636_v10  ;;  %v645_v38 = vld [vmem:[#allocation3 + $0x78] sm:$0xff]  ;;  %v644_v39 = vld [vmem:[#allocation3 + $0x70] sm:$0xff]  ;;  %v669_v40 = vld [vmem:[%s813_s4 + $0x1] ss:$0 sm:$0xff] }
  0x10   :  { %303 = vmatpush.bf16.msra.mxu3 %v645_v38  ;;  %v643_v46 = vld [vmem:[#allocation3 + $0x68] sm:$0xff]  ;;  %v642_v47 = vld [vmem:[#allocation3 + $0x60] sm:$0xff]  ;;  %v649_v48 = vld [vmem:[#allocation3 + $0x98] sm:$0xff] }
  0x11   :  { %v648_v49 = vld [vmem:[#allocation3 + $0x90] sm:$0xff]  ;;  %v647_v50 = vld [vmem:[#allocation3 + $0x88] sm:$0xff]  ;;  %v670_v51 = vld [vmem:[%s813_s4 + $0x2] ss:$0 sm:$0xff] }
  0x12   :  { %62 = vperm.xlu0 %662, %v501_v4   ;;  %248 = vmatpush.bf16.msra.mxu2 %v640_v29  ;;  %v646_v57 = vld [vmem:[#allocation3 + $0x80] sm:$0xff]  ;;  %v653_v58 = vld [vmem:[#allocation3 + $0xb8] sm:$0xff]  ;;  %v652_v59 = vld [vmem:[#allocation3 + $0xb0] sm:$0xff] }
  0x13   :  { %137 = vmatpush.bf16.msra.mxu0 %v631_v7  ;;  %193 = vmatpush.bf16.msra.mxu1 %v635_v26  ;;  %v651_v60 = vld [vmem:[#allocation3 + $0xa8] sm:$0xff]  ;;  %v671_v61 = vld [vmem:[%s813_s4 + $0x3] ss:$0 sm:$0xff]  ;;  %v657_v4 = vld [vmem:[#allocation3 + $0xd8] sm:$0xff] }
  0x14   :  { %304 = vmatpush.bf16.msra.mxu3 %v644_v39  ;;  %v650_v3 = vld [vmem:[#allocation3 + $0xa0] sm:$0xff]  ;;  %v656_v5 = vld [vmem:[#allocation3 + $0xd0] sm:$0xff]  ;;  %v655_v6 = vld [vmem:[#allocation3 + $0xc8] sm:$0xff] }
  0x15   :  { %v672_v7 = vld [vmem:[%s813_s4 + $0x4] ss:$0 sm:$0xff]  ;;  %v676_v28 = vld [vmem:[#allocation2] ss:$0 sm:$0xff] }
  0x16   :  { %249 = vmatpush.bf16.msra.mxu2 %v639_v36 }
  0x17   :  { %138 = vmatpush.bf16.msra.mxu0 %v630_v8  ;;  %194 = vmatpush.bf16.msra.mxu1 %v634_v27 }
  0x18   :  { %305 = vmatpush.bf16.msra.mxu3 %v643_v46 }
  0x1a   :  { %250 = vmatpush.bf16.msra.mxu2 %v638_v37 }
  0x1b   :  { %359 = vmatpush.bf16.msrb.mxu0 %v649_v48  ;;  %415 = vmatpush.bf16.msrb.mxu1 %v653_v58 }
  0x1c   :  { %306 = vmatpush.bf16.msra.mxu3 %v642_v47 }
  0x1e   :  { %471 = vmatpush.bf16.msrb.mxu2 %v657_v4 }
  0x1f   :  { %360 = vmatpush.bf16.msrb.mxu0 %v648_v49  ;;  %416 = vmatpush.bf16.msrb.mxu1 %v652_v59 }
  0x22   :  { %472 = vmatpush.bf16.msrb.mxu2 %v656_v5 }
  0x23   :  { %361 = vmatpush.bf16.msrb.mxu0 %v647_v50  ;;  %417 = vmatpush.bf16.msrb.mxu1 %v651_v60 }
  0x26   :  { %473 = vmatpush.bf16.msrb.mxu2 %v655_v6 }
  0x27   :  { %362 = vmatpush.bf16.msrb.mxu0 %v646_v57  ;;  %418 = vmatpush.bf16.msrb.mxu1 %v650_v3 }
  0x7c   :  { %v50_v11 = vpop.permute.xlu0 %49  ;;  %v77_v15 = vpop.permute.xlu1 %76 }
  0x7d   :  { %v55_v17 = vmul.f32 %v664_v12, %v50_v11  ;;  %v82_v19 = vmul.f32 %v666_v14, %v77_v15  ;;  %v673_v14 = vld [vmem:[%s813_s4 + $0x5] ss:$0 sm:$0xff] }
  0x84   :  { %v63_v16 = vpop.permute.xlu0 %62 }
  0x85   :  { %v68_v18 = vmul.f32 %v665_v13, %v63_v16  ;;  %v654_v13 = vld [vmem:[#allocation3 + $0xc0] sm:$0xff] }
  0x86   :  { %474 = vmatpush.bf16.msrb.mxu2 %v654_v13 }
  0x87   :  { %v69_v20 = vadd.f32 %v68_v18, %v55_v17 }
  0x89   :  { %v83_v22 = vadd.f32 %v82_v19, %v69_v20  ;;  %v674_v20 = vld [vmem:[%s813_s4 + $0x6] ss:$0 sm:$0xff] }
  0x8b   :  { %v88_v23 = vadd.f32 %v667_v21, %v83_v22 }
  0x8d   :  { %v89_v24 = vmax.f32 %v88_v23, 0.0  ;;  %v675_v23 = vld [vmem:[%s814_s5] ss:$0 sm:$0xff] }
  0x8f   :  { %v90_v25 = vpack.c.bf16 %v89_v24, %v89_v24 }
  0x91   :  { %521 = vmatmul.msk.bf16.vlgmr.msra.gmra.mxu0 %vm127_vm0, %v90_v25 }
 0x10e   :  { %v140_v31 = vpop.f32.mrf.mxu0 }
 0x10f   :  { %v141_v32 = vadd.f32 %v668_v30, %v140_v31 }
 0x111   :  { %v144_v33 = vmax.f32 %v141_v32, 0.0 }
 0x113   :  { %v145_v34 = vpack.c.bf16 %v144_v33, %v144_v33 }
 0x115   :  { %539 = vmatmul.msk.bf16.vlgmr.msra.gmra.mxu1 %vm127_vm0, %v145_v34 }
 0x116   :  { %v142_v35 = vpop.f32.mrf.mxu0 }
 0x192   :  { %v196_v41 = vpop.f32.mrf.mxu1 }
 0x193   :  { %v197_v42 = vadd.f32 %v669_v40, %v196_v41 }
 0x195   :  { %v200_v43 = vmax.f32 %v197_v42, 0.0 }
 0x197   :  { %v201_v44 = vpack.c.bf16 %v200_v43, %v200_v43 }
 0x199   :  { %557 = vmatmul.msk.bf16.vlgmr.msra.gmra.mxu2 %vm127_vm0, %v201_v44 }
 0x19a   :  { %v198_v45 = vpop.f32.mrf.mxu1 }
 0x21c   :  { %v252_v52 = vpop.f32.mrf.mxu2 }
 0x21d   :  { %v253_v53 = vadd.f32 %v670_v51, %v252_v52 }
 0x21f   :  { %v256_v54 = vmax.f32 %v253_v53, 0.0 }
 0x221   :  { %v257_v55 = vpack.c.bf16 %v256_v54, %v256_v54 }
 0x223   :  { %575 = vmatmul.msk.bf16.vlgmr.msra.gmra.mxu3 %vm127_vm0, %v257_v55 }
 0x224   :  { %v254_v56 = vpop.f32.mrf.mxu2 }
 0x2a6   :  { %v308_v62 = vpop.f32.mrf.mxu3 }
 0x2a7   :  { %v309_v63 = vadd.f32 %v671_v61, %v308_v62 }
 0x2a9   :  { %v312_v0 = vmax.f32 %v309_v63, 0.0 }
 0x2ab   :  { %v313_v1 = vpack.c.bf16 %v312_v0, %v312_v0 }
 0x2ad   :  { %593 = vmatmul.msk.bf16.vlgmr.msrb.gmra.mxu0 %vm127_vm0, %v313_v1 }
 0x2ae   :  { %v310_v2 = vpop.f32.mrf.mxu3 }
 0x32a   :  { %v364_v8 = vpop.f32.mrf.mxu0 }
 0x32b   :  { %v365_v9 = vadd.f32 %v672_v7, %v364_v8 }
 0x32d   :  { %v368_v10 = vmax.f32 %v365_v9, 0.0 }
 0x32f   :  { %v369_v11 = vpack.c.bf16 %v368_v10, %v368_v10 }
 0x331   :  { %611 = vmatmul.msk.bf16.vlgmr.msrb.gmra.mxu1 %vm127_vm0, %v369_v11 }
 0x332   :  { %v366_v12 = vpop.f32.mrf.mxu0 }
 0x3ae   :  { %v420_v15 = vpop.f32.mrf.mxu1 }
 0x3af   :  { %v421_v16 = vadd.f32 %v673_v14, %v420_v15 }
 0x3b1   :  { %v424_v17 = vmax.f32 %v421_v16, 0.0 }
 0x3b3   :  { %v425_v18 = vpack.c.bf16 %v424_v17, %v424_v17 }
 0x3b5   :  { %629 = vmatmul.msk.bf16.vlgmr.msrb.gmra.mxu2 %vm127_vm0, %v425_v18 }
 0x3b6   :  { %v422_v19 = vpop.f32.mrf.mxu1 }
 0x438   :  { %v476_v21 = vpop.f32.mrf.mxu2 }
 0x439   :  { %v477_v22 = vadd.f32 %v674_v20, %v476_v21 }
 0x43b   :  { %v480_v24 = vmax.f32 %v477_v22, 0.0 }
 0x43d   :  { %v485_v25 = vmul.f32 %v675_v23, %v480_v24 }
 0x43f   :  { %v486_v26 = vsel %vm127_vm0, %v485_v25, 0.0 }
 0x440   :  { %v478_v27 = vpop.f32.mrf.mxu2  ;;  %487 = vadd.xlane.f32.xlu1 %v486_v26 }
 0x4b3   :  { %v488_v29 = vpop.xlane.xlu1 %487 }
 0x4b4   :  { %v493_v30 = vadd.f32 %v676_v28, %v488_v29 }
 0x4b6   :  { %495 = vst.msk [vmem:[%s816_s7] sm:$0xff] %vm494_vm1, %v493_v30 }
 0x4b7   :  { %500 = vsyncpa [#allocation4], 1 }

</bundles_post_ra>
